<compile_context>
chip_gen: v7x
topology: tpu7x:2x2x1
jax: 0.10.0
libtpu: 0.0.40
codegen_flags: <defaults>
</compile_context>

<pallas_src>
import functools

import jax
import jax.numpy as jnp
from jax.experimental import pallas as pl
from jax.experimental.pallas import tpu as pltpu


# module-constant hidden sizes (from the PyTorch spec)
H1 = 256      # first feature layer
H2 = 128      # second feature layer (== fused head-1 width: 64 actor | 64 critic)
HEAD = 64     # per-head hidden size
OUT_P = 128   # lane-dense padded output width (action_mean | value | zeros)
VEC_ROWS = 8  # rows in the packed vector-parameter slab


def _round_up(x, m):
    return ((x + m - 1) // m) * m


# ----------------------------- kernel helpers ------------------------------ #

def _gelu(x):
    # tanh-approximate GELU -> routed through EUP (separate VLIW slot).
    return jax.nn.gelu(x, approximate=True)


def _layernorm(x, gamma, beta, eps=1e-5):
    # torch.nn.LayerNorm: biased variance, eps inside rsqrt, affine broadcast.
    mu = jnp.mean(x, axis=-1, keepdims=True)
    var = jnp.mean(jnp.square(x - mu), axis=-1, keepdims=True)
    return (x - mu) * jax.lax.rsqrt(var + eps) * gamma + beta


# --------------------------------- kernel ---------------------------------- #

def actor_critic_kernel(state_ref, mats_ref, vecs_ref, out_ref, *, sd_p, action_dim):
    # --- carve parameters out of the packed slabs (static, aligned views) ---
    w1 = mats_ref[0:sd_p, :]                                    # [sd_p, 256] bf16
    w2 = mats_ref[sd_p:sd_p + H1, 0:H2]                         # [256, 128]  bf16
    wh1 = mats_ref[sd_p + H1:sd_p + H1 + H2, 0:H2]              # [128, 128]  bf16 (wa1 | wc1)
    wh2 = mats_ref[sd_p + H1 + H2:sd_p + H1 + 2 * H2, 0:OUT_P]  # [128, 128]  bf16 (block-diag wa2/wc2)

    b1 = vecs_ref[0:1, 0:H1]
    g1 = vecs_ref[1:2, 0:H1]
    be1 = vecs_ref[2:3, 0:H1]
    b2 = vecs_ref[3:4, 0:H2]
    g2 = vecs_ref[4:5, 0:H2]
    be2 = vecs_ref[5:6, 0:H2]
    bh1 = vecs_ref[6:7, 0:H2]
    bh2 = vecs_ref[7:8, 0:OUT_P]

    x = state_ref[...].astype(jnp.bfloat16)                     # [TM, sd_p]

    # --- feature extractor ---
    h1 = jnp.dot(x, w1, preferred_element_type=jnp.float32) + b1
    h1 = _gelu(_layernorm(h1, g1, be1))

    h2 = jnp.dot(h1.astype(jnp.bfloat16), w2, preferred_element_type=jnp.float32) + b2
    feats = _gelu(_layernorm(h2, g2, be2))

    # --- fused actor/critic heads ---
    hh = _gelu(
        jnp.dot(feats.astype(jnp.bfloat16), wh1, preferred_element_type=jnp.float32) + bh1
    )                                                           # [TM, 128] (actor | critic)

    z = jnp.dot(hh.astype(jnp.bfloat16), wh2, preferred_element_type=jnp.float32) + bh2

    # tanh only on actor lanes; lane `action_dim` carries the critic value untouched.
    lane = jax.lax.broadcasted_iota(jnp.int32, z.shape, 1)
    out_ref[...] = jnp.where(lane < action_dim, jnp.tanh(z), z)


# -------------------------------- wrapper ----------------------------------- #

@functools.partial(jax.jit, static_argnames=("action_dim", "block_m"))
def actor_critic_forward(state, mats, vecs, *, action_dim, block_m=256):
    B, state_dim = state.shape
    sd_p = _round_up(state_dim, 8)

    tm = min(block_m, _round_up(B, 8))
    b_pad = _round_up(B, tm)

    # zero-pad batch rows and state columns (w1's padded rows are zero too).
    x = jnp.zeros((b_pad, sd_p), jnp.float32).at[:B, :state_dim].set(state)

    kernel = functools.partial(actor_critic_kernel, sd_p=sd_p, action_dim=action_dim)

    out = pl.pallas_call(
        kernel,
        out_shape=jax.ShapeDtypeStruct((b_pad, OUT_P), jnp.float32),
        grid_spec=pltpu.PrefetchScalarGridSpec(
            num_scalar_prefetch=0,
            grid=(b_pad // tm,),
            in_specs=[
                pl.BlockSpec((tm, sd_p), lambda i: (i, 0)),
                pl.BlockSpec(mats.shape, lambda i: (0, 0)),   # resident across batch tiles
                pl.BlockSpec(vecs.shape, lambda i: (0, 0)),   # resident across batch tiles
            ],
            out_specs=pl.BlockSpec((tm, OUT_P), lambda i: (i, 0)),
        ),
        compiler_params=pltpu.CompilerParams(
            dimension_semantics=("parallel",),
        ),
    )(x, mats, vecs)

    action_mean = out[:B, :action_dim]
    value = out[:B, action_dim:action_dim + 1]
    # on-device NaN guard (single scalar; host syncs once instead of reading outputs).
    nan_flag = jnp.any(jnp.isnan(action_mean)) | jnp.any(jnp.isnan(value))
    return action_mean, value, nan_flag


# --------------------------- deterministic init ----------------------------- #

def _orthogonal(key, out_dim, in_dim):
    """Orthogonal init (like nn.init.orthogonal_), returned as [out_dim, in_dim]."""
    rows, cols = out_dim, in_dim
    flat = jax.random.normal(key, (max(rows, cols), min(rows, cols)), jnp.float32)
    q, r = jnp.linalg.qr(flat)
    d = jnp.diagonal(r)
    q = q * jnp.where(d >= 0.0, 1.0, -1.0)   # robust sign fix (never zero)
    if rows < cols:
        q = q.T
    return q[:rows, :cols]


def init_params(key, state_dim, action_dim):
    ks = jax.random.split(key, 6)

    def linear(k, in_dim, out_dim):
        w = _orthogonal(k, out_dim, in_dim).T          # stored as [in, out]
        b = jnp.full((1, out_dim), 0.1, jnp.float32)   # nn.init.constant_(bias, 0.1)
        return w, b

    w1, b1 = linear(ks[0], state_dim, H1)
    w2, b2 = linear(ks[1], H1, H2)
    wa1, ba1 = linear(ks[2], H2, HEAD)
    wa2, ba2 = linear(ks[3], HEAD, action_dim)
    wc1, bc1 = linear(ks[4], H2, HEAD)
    wc2, bc2 = linear(ks[5], HEAD, 1)

    return dict(
        w1=w1, b1=b1,
        g1=jnp.ones((1, H1), jnp.float32), be1=jnp.zeros((1, H1), jnp.float32),
        w2=w2, b2=b2,
        g2=jnp.ones((1, H2), jnp.float32), be2=jnp.zeros((1, H2), jnp.float32),
        wa1=wa1, ba1=ba1, wa2=wa2, ba2=ba2,
        wc1=wc1, bc1=bc1, wc2=wc2, bc2=bc2,
    )


def pack_params(params, state_dim, action_dim):
    """Pack everything into (bf16 matrix slab [sd_p+512, 256], f32 vector slab [8, 256])."""
    assert action_dim + 1 <= OUT_P
    sd_p = _round_up(state_dim, 8)

    w1 = jnp.zeros((sd_p, H1), jnp.float32).at[:state_dim].set(params["w1"])
    w2 = params["w2"]                                                   # [256, 128]
    wh1 = jnp.concatenate([params["wa1"], params["wc1"]], axis=1)       # [128, 128]
    wh2 = jnp.zeros((H2, OUT_P), jnp.float32)
    wh2 = wh2.at[0:HEAD, 0:action_dim].set(params["wa2"])               # actor lanes
    wh2 = wh2.at[HEAD:2 * HEAD, action_dim:action_dim + 1].set(params["wc2"])  # value lane

    def pad_lanes(m):
        return jnp.pad(m, ((0, 0), (0, H1 - m.shape[1])))

    mats = jnp.concatenate(
        [pad_lanes(w1), pad_lanes(w2), pad_lanes(wh1), pad_lanes(wh2)], axis=0
    ).astype(jnp.bfloat16)                                              # [sd_p+512, 256]

    def row(v):
        v = v.reshape(1, -1)
        return jnp.pad(v, ((0, 0), (0, H1 - v.shape[1])))

    bh1 = jnp.concatenate([params["ba1"], params["bc1"]], axis=1)       # [1, 128]
    bh2 = jnp.zeros((1, OUT_P), jnp.float32)
    bh2 = bh2.at[0, 0:action_dim].set(params["ba2"][0])
    bh2 = bh2.at[0, action_dim].set(params["bc2"][0, 0])

    vecs = jnp.concatenate(
        [row(params["b1"]), row(params["g1"]), row(params["be1"]),
         row(params["b2"]), row(params["g2"]), row(params["be2"]),
         row(bh1), row(bh2)],
        axis=0,
    ).astype(jnp.float32)                                               # [8, 256]

    return mats, vecs


# ---------------------------------- main ------------------------------------ #

if __name__ == "__main__":
    STATE_DIM = 8
    ACTION_DIM = 4
    BATCH = 2

    key = jax.random.PRNGKey(0)
    pkey, xkey = jax.random.split(key)

    params = init_params(pkey, STATE_DIM, ACTION_DIM)
    mats, vecs = pack_params(params, STATE_DIM, ACTION_DIM)   # packed once, reused per step
    state = jax.random.normal(xkey, (BATCH, STATE_DIM), jnp.float32)

    action_mean, value, nan_flag = actor_critic_forward(
        state, mats, vecs, action_dim=ACTION_DIM
    )
    jax.block_until_ready((action_mean, value, nan_flag))

    # mirror the module's NaN guard (device-computed flag, single host sync)
    if bool(nan_flag):
        raise ValueError("Network output contains NaN values!")

    assert action_mean.shape == (BATCH, ACTION_DIM)
    assert value.shape == (BATCH, 1)
    print("KERNEL_OK")
</pallas_src>

<mosaic_0001>
module attributes {stable_mosaic.version = 11 : i64} {
  func.func @actor_critic_kernel(%arg0: i32, %arg1: memref<8x8xf32, #tpu.memory_space<vmem>>, %arg2: memref<520x256xbf16, #tpu.memory_space<vmem>>, %arg3: memref<8x256xf32, #tpu.memory_space<vmem>>, %arg4: memref<8x128xf32, #tpu.memory_space<vmem>>) attributes {dimension_semantics = [#tpu.dimension_semantics<parallel>], iteration_bounds = array<i64: 1>, scalar_prefetch = 0 : i64, scratch_operands = 0 : i64, tpu.core_type = #tpu.core_type<tc>, window_params = [{transform_indices = @transform_0, window_bounds = array<i64: 8, 8>}, {pipeline_mode = #tpu.pipeline_mode<synchronous>, transform_indices = @transform_1, window_bounds = array<i64: 520, 256>}, {pipeline_mode = #tpu.pipeline_mode<synchronous>, transform_indices = @transform_2, window_bounds = array<i64: 8, 256>}, {transform_indices = @transform_3, window_bounds = array<i64: 8, 128>}]} {
    %c0 = arith.constant 0 : index
    %c0_0 = arith.constant 0 : index
    %0 = vector.load %arg2[%c0, %c0_0] : memref<520x256xbf16, #tpu.memory_space<vmem>>, vector<8x256xbf16>
    %c8 = arith.constant 8 : index
    %c0_1 = arith.constant 0 : index
    %1 = vector.load %arg2[%c8, %c0_1] : memref<520x256xbf16, #tpu.memory_space<vmem>>, vector<256x128xbf16>
    %c264 = arith.constant 264 : index
    %c0_2 = arith.constant 0 : index
    %2 = vector.load %arg2[%c264, %c0_2] : memref<520x256xbf16, #tpu.memory_space<vmem>>, vector<128x128xbf16>
    %c392 = arith.constant 392 : index
    %c0_3 = arith.constant 0 : index
    %3 = vector.load %arg2[%c392, %c0_3] : memref<520x256xbf16, #tpu.memory_space<vmem>>, vector<128x128xbf16>
    %c0_4 = arith.constant 0 : index
    %c0_5 = arith.constant 0 : index
    %4 = vector.load %arg3[%c0_4, %c0_5] : memref<8x256xf32, #tpu.memory_space<vmem>>, vector<1x256xf32>
    %c1 = arith.constant 1 : index
    %c0_6 = arith.constant 0 : index
    %5 = vector.load %arg3[%c1, %c0_6] : memref<8x256xf32, #tpu.memory_space<vmem>>, vector<1x256xf32>
    %c2 = arith.constant 2 : index
    %c0_7 = arith.constant 0 : index
    %6 = vector.load %arg3[%c2, %c0_7] : memref<8x256xf32, #tpu.memory_space<vmem>>, vector<1x256xf32>
    %c3 = arith.constant 3 : index
    %c0_8 = arith.constant 0 : index
    %7 = vector.load %arg3[%c3, %c0_8] : memref<8x256xf32, #tpu.memory_space<vmem>>, vector<1x128xf32>
    %c4 = arith.constant 4 : index
    %c0_9 = arith.constant 0 : index
    %8 = vector.load %arg3[%c4, %c0_9] : memref<8x256xf32, #tpu.memory_space<vmem>>, vector<1x128xf32>
    %c5 = arith.constant 5 : index
    %c0_10 = arith.constant 0 : index
    %9 = vector.load %arg3[%c5, %c0_10] : memref<8x256xf32, #tpu.memory_space<vmem>>, vector<1x128xf32>
    %c6 = arith.constant 6 : index
    %c0_11 = arith.constant 0 : index
    %10 = vector.load %arg3[%c6, %c0_11] : memref<8x256xf32, #tpu.memory_space<vmem>>, vector<1x128xf32>
    %c7 = arith.constant 7 : index
    %c0_12 = arith.constant 0 : index
    %11 = vector.load %arg3[%c7, %c0_12] : memref<8x256xf32, #tpu.memory_space<vmem>>, vector<1x128xf32>
    %c0_13 = arith.constant 0 : index
    %c0_14 = arith.constant 0 : index
    %12 = vector.load %arg1[%c0_13, %c0_14] : memref<8x8xf32, #tpu.memory_space<vmem>>, vector<8x8xf32>
    %13 = arith.truncf %12 : vector<8x8xf32> to vector<8x8xbf16>
    %cst = arith.constant dense<0.000000e+00> : vector<8x256xf32>
    %14 = tpu.matmul %13, %0, %cst {dimension_numbers = #tpu.dot_dimension_numbers<[1], [0], [0], [1], [0, 0, 1, 1], [], []>} : vector<8x8xbf16>, vector<8x256xbf16>, vector<8x256xf32> -> vector<8x256xf32>
    %15 = vector.broadcast %4 : vector<1x256xf32> to vector<8x256xf32>
    %16 = arith.addf %14, %15 : vector<8x256xf32>
    %cst_15 = arith.constant dense<0.000000e+00> : vector<8xf32>
    %17 = vector.multi_reduction <add>, %16, %cst_15 [1] : vector<8x256xf32> to vector<8xf32>
    %18 = vector.shape_cast %17 : vector<8xf32> to vector<8x1xf32>
    %cst_16 = arith.constant 2.560000e+02 : f32
    %19 = vector.broadcast %cst_16 : f32 to vector<8x1xf32>
    %20 = arith.divf %18, %19 : vector<8x1xf32>
    %21 = vector.broadcast %20 : vector<8x1xf32> to vector<8x256xf32>
    %22 = arith.subf %16, %21 : vector<8x256xf32>
    %23 = arith.mulf %22, %22 : vector<8x256xf32>
    %cst_17 = arith.constant dense<0.000000e+00> : vector<8xf32>
    %24 = vector.multi_reduction <add>, %23, %cst_17 [1] : vector<8x256xf32> to vector<8xf32>
    %25 = vector.shape_cast %24 : vector<8xf32> to vector<8x1xf32>
    %cst_18 = arith.constant 2.560000e+02 : f32
    %26 = vector.broadcast %cst_18 : f32 to vector<8x1xf32>
    %27 = arith.divf %25, %26 : vector<8x1xf32>
    %28 = vector.broadcast %20 : vector<8x1xf32> to vector<8x256xf32>
    %29 = arith.subf %16, %28 : vector<8x256xf32>
    %cst_19 = arith.constant 9.99999974E-6 : f32
    %30 = vector.broadcast %cst_19 : f32 to vector<8x1xf32>
    %31 = arith.addf %27, %30 : vector<8x1xf32>
    %32 = math.rsqrt %31 : vector<8x1xf32>
    %33 = vector.broadcast %32 : vector<8x1xf32> to vector<8x256xf32>
    %34 = arith.mulf %29, %33 : vector<8x256xf32>
    %35 = vector.broadcast %5 : vector<1x256xf32> to vector<8x256xf32>
    %36 = arith.mulf %34, %35 : vector<8x256xf32>
    %37 = vector.broadcast %6 : vector<1x256xf32> to vector<8x256xf32>
    %38 = arith.addf %36, %37 : vector<8x256xf32>
    %39 = arith.mulf %38, %38 : vector<8x256xf32>
    %40 = arith.mulf %38, %39 : vector<8x256xf32>
    %cst_20 = arith.constant 4.471500e-02 : f32
    %41 = vector.broadcast %cst_20 : f32 to vector<8x256xf32>
    %42 = arith.mulf %41, %40 : vector<8x256xf32>
    %43 = arith.addf %38, %42 : vector<8x256xf32>
    %cst_21 = arith.constant 0.797884583 : f32
    %44 = vector.broadcast %cst_21 : f32 to vector<8x256xf32>
    %45 = arith.mulf %44, %43 : vector<8x256xf32>
    %46 = math.tanh %45 : vector<8x256xf32>
    %cst_22 = arith.constant 1.000000e+00 : f32
    %47 = vector.broadcast %cst_22 : f32 to vector<8x256xf32>
    %48 = arith.addf %47, %46 : vector<8x256xf32>
    %cst_23 = arith.constant 5.000000e-01 : f32
    %49 = vector.broadcast %cst_23 : f32 to vector<8x256xf32>
    %50 = arith.mulf %49, %48 : vector<8x256xf32>
    %51 = arith.mulf %38, %50 : vector<8x256xf32>
    %52 = arith.truncf %51 : vector<8x256xf32> to vector<8x256xbf16>
    %cst_24 = arith.constant dense<0.000000e+00> : vector<8x128xf32>
    %53 = tpu.matmul %52, %1, %cst_24 {dimension_numbers = #tpu.dot_dimension_numbers<[1], [0], [0], [1], [0, 0, 1, 1], [], []>} : vector<8x256xbf16>, vector<256x128xbf16>, vector<8x128xf32> -> vector<8x128xf32>
    %54 = vector.broadcast %7 : vector<1x128xf32> to vector<8x128xf32>
    %55 = arith.addf %53, %54 : vector<8x128xf32>
    %cst_25 = arith.constant dense<0.000000e+00> : vector<8xf32>
    %56 = vector.multi_reduction <add>, %55, %cst_25 [1] : vector<8x128xf32> to vector<8xf32>
    %57 = vector.shape_cast %56 : vector<8xf32> to vector<8x1xf32>
    %cst_26 = arith.constant 1.280000e+02 : f32
    %58 = vector.broadcast %cst_26 : f32 to vector<8x1xf32>
    %59 = arith.divf %57, %58 : vector<8x1xf32>
    %60 = vector.broadcast %59 : vector<8x1xf32> to vector<8x128xf32>
    %61 = arith.subf %55, %60 : vector<8x128xf32>
    %62 = arith.mulf %61, %61 : vector<8x128xf32>
    %cst_27 = arith.constant dense<0.000000e+00> : vector<8xf32>
    %63 = vector.multi_reduction <add>, %62, %cst_27 [1] : vector<8x128xf32> to vector<8xf32>
    %64 = vector.shape_cast %63 : vector<8xf32> to vector<8x1xf32>
    %cst_28 = arith.constant 1.280000e+02 : f32
    %65 = vector.broadcast %cst_28 : f32 to vector<8x1xf32>
    %66 = arith.divf %64, %65 : vector<8x1xf32>
    %67 = vector.broadcast %59 : vector<8x1xf32> to vector<8x128xf32>
    %68 = arith.subf %55, %67 : vector<8x128xf32>
    %cst_29 = arith.constant 9.99999974E-6 : f32
    %69 = vector.broadcast %cst_29 : f32 to vector<8x1xf32>
    %70 = arith.addf %66, %69 : vector<8x1xf32>
    %71 = math.rsqrt %70 : vector<8x1xf32>
    %72 = vector.broadcast %71 : vector<8x1xf32> to vector<8x128xf32>
    %73 = arith.mulf %68, %72 : vector<8x128xf32>
    %74 = vector.broadcast %8 : vector<1x128xf32> to vector<8x128xf32>
    %75 = arith.mulf %73, %74 : vector<8x128xf32>
    %76 = vector.broadcast %9 : vector<1x128xf32> to vector<8x128xf32>
    %77 = arith.addf %75, %76 : vector<8x128xf32>
    %78 = arith.mulf %77, %77 : vector<8x128xf32>
    %79 = arith.mulf %77, %78 : vector<8x128xf32>
    %cst_30 = arith.constant 4.471500e-02 : f32
    %80 = vector.broadcast %cst_30 : f32 to vector<8x128xf32>
    %81 = arith.mulf %80, %79 : vector<8x128xf32>
    %82 = arith.addf %77, %81 : vector<8x128xf32>
    %cst_31 = arith.constant 0.797884583 : f32
    %83 = vector.broadcast %cst_31 : f32 to vector<8x128xf32>
    %84 = arith.mulf %83, %82 : vector<8x128xf32>
    %85 = math.tanh %84 : vector<8x128xf32>
    %cst_32 = arith.constant 1.000000e+00 : f32
    %86 = vector.broadcast %cst_32 : f32 to vector<8x128xf32>
    %87 = arith.addf %86, %85 : vector<8x128xf32>
    %cst_33 = arith.constant 5.000000e-01 : f32
    %88 = vector.broadcast %cst_33 : f32 to vector<8x128xf32>
    %89 = arith.mulf %88, %87 : vector<8x128xf32>
    %90 = arith.mulf %77, %89 : vector<8x128xf32>
    %91 = arith.truncf %90 : vector<8x128xf32> to vector<8x128xbf16>
    %cst_34 = arith.constant dense<0.000000e+00> : vector<8x128xf32>
    %92 = tpu.matmul %91, %2, %cst_34 {dimension_numbers = #tpu.dot_dimension_numbers<[1], [0], [0], [1], [0, 0, 1, 1], [], []>} : vector<8x128xbf16>, vector<128x128xbf16>, vector<8x128xf32> -> vector<8x128xf32>
    %93 = vector.broadcast %10 : vector<1x128xf32> to vector<8x128xf32>
    %94 = arith.addf %92, %93 : vector<8x128xf32>
    %95 = arith.mulf %94, %94 : vector<8x128xf32>
    %96 = arith.mulf %94, %95 : vector<8x128xf32>
    %cst_35 = arith.constant 4.471500e-02 : f32
    %97 = vector.broadcast %cst_35 : f32 to vector<8x128xf32>
    %98 = arith.mulf %97, %96 : vector<8x128xf32>
    %99 = arith.addf %94, %98 : vector<8x128xf32>
    %cst_36 = arith.constant 0.797884583 : f32
    %100 = vector.broadcast %cst_36 : f32 to vector<8x128xf32>
    %101 = arith.mulf %100, %99 : vector<8x128xf32>
    %102 = math.tanh %101 : vector<8x128xf32>
    %cst_37 = arith.constant 1.000000e+00 : f32
    %103 = vector.broadcast %cst_37 : f32 to vector<8x128xf32>
    %104 = arith.addf %103, %102 : vector<8x128xf32>
    %cst_38 = arith.constant 5.000000e-01 : f32
    %105 = vector.broadcast %cst_38 : f32 to vector<8x128xf32>
    %106 = arith.mulf %105, %104 : vector<8x128xf32>
    %107 = arith.mulf %94, %106 : vector<8x128xf32>
    %108 = arith.truncf %107 : vector<8x128xf32> to vector<8x128xbf16>
    %cst_39 = arith.constant dense<0.000000e+00> : vector<8x128xf32>
    %109 = tpu.matmul %108, %3, %cst_39 {dimension_numbers = #tpu.dot_dimension_numbers<[1], [0], [0], [1], [0, 0, 1, 1], [], []>} : vector<8x128xbf16>, vector<128x128xbf16>, vector<8x128xf32> -> vector<8x128xf32>
    %110 = vector.broadcast %11 : vector<1x128xf32> to vector<8x128xf32>
    %111 = arith.addf %109, %110 : vector<8x128xf32>
    %112 = tpu.iota {dimensions = array<i32: 1>} : vector<8x128xi32>
    %c4_i32 = arith.constant 4 : i32
    %113 = vector.broadcast %c4_i32 : i32 to vector<8x128xi32>
    %114 = arith.cmpi slt, %112, %113 : vector<8x128xi32>
    %115 = math.tanh %111 : vector<8x128xf32>
    %116 = arith.select %114, %115, %111 : vector<8x128xi1>, vector<8x128xf32>
    %c0_40 = arith.constant 0 : index
    %c0_41 = arith.constant 0 : index
    %117 = vector.load %arg4[%c0_40, %c0_41] : memref<8x128xf32, #tpu.memory_space<vmem>>, vector<8x128xf32>
    tpu.vector_store %arg4[%c0_40, %c0_41], %116 {strides = array<i32>} : memref<8x128xf32, #tpu.memory_space<vmem>>, vector<8x128xf32>,
    return
  }
  func.func @transform_0(%arg0: i32) -> (i32, i32) {
    %c0_i32 = arith.constant 0 : i32
    %c0_i32_0 = arith.constant 0 : i32
    return %arg0, %c0_i32 : i32, i32
  }
  func.func @transform_1(%arg0: i32) -> (i32, i32) {
    %c0_i32 = arith.constant 0 : i32
    %c0_i32_0 = arith.constant 0 : i32
    %c0_i32_1 = arith.constant 0 : i32
    return %c0_i32, %c0_i32_0 : i32, i32
  }
  func.func @transform_2(%arg0: i32) -> (i32, i32) {
    %c0_i32 = arith.constant 0 : i32
    %c0_i32_0 = arith.constant 0 : i32
    %c0_i32_1 = arith.constant 0 : i32
    return %c0_i32, %c0_i32_0 : i32, i32
  }
  func.func @transform_3(%arg0: i32) -> (i32, i32) {
    %c0_i32 = arith.constant 0 : i32
    %c0_i32_0 = arith.constant 0 : i32
    return %arg0, %c0_i32 : i32, i32
  }
}

</mosaic_0001>

<bundles_post_ra>
// kernel: actor_critic_forward.1
= control target key start
LH: loop header
LB: loop body
LE: loop exit
PB: predicated region body
PF: predicated region fallthrough
CT: control target
= control target key end

     0   :  { %8 = vsyncpa [#allocation3], 0  ;;  %s790_s12 = smov [#allocation2]   ;;  %s888_s0 = inlined_call_operand.vmem [shape: f32[8,8], index: 0, kind: input, shape index: {}]   ;;  %s889_s1 = inlined_call_operand.hbm [shape: bf16[520,256], index: 1, kind: input, shape index: {}]   ;;  %s890_s2 = inlined_call_operand.vmem [shape: f32[8,256], index: 2, kind: input, shape index: {}]   ;;  %s891_s3 = inlined_call_operand.vmem [shape: f32[8,128], index: 3, kind: output, shape index: {}]  }
   0x1   :  { %s16_s13 = sshll.u32 %s790_s12, 4  ;;  %s766_s16 = scalar_lea.hbm %s889_s1, 8320  ;;  %s17_s13 = int_to_ptr.vmem [resolvable:$true] %s16_s13 }
   0x2   :  { %p767_p0 = scmp.ne.s32.totalorder %s889_s1, %s766_s16  ;;  %p770_p1 = scmp.lt.u32.totalorder %s766_s16, %s889_s1 }
   0x4   :  { %p772_p2 = pnand %p770_p1, %p767_p0 }
   0x6   :  { %775 = shalt.err (!%p772_p2)
}
   0x7   :  { %s776_s21 = scalar_lea.vmem %s17_s13, 8320  ;;  %p781_p4 = scmp.lt.s32.totalorder %s17_s13, %s17_s13 }
   0x8   :  { %p777_p3 = scmp.ne.s32.totalorder %s17_s13, %s776_s21  ;;  %p782_p5 = scmp.lt.s32.totalorder %s776_s21, %s776_s21 }
   0xa   :  { %p783_p6 = por %p782_p5, %p781_p4 }
   0xc   :  { %p784_p7 = pnand %p783_p6, %p777_p3 }
   0xe   :  { %787 = shalt.err (!%p784_p7)
}
   0xf   :  { %s791_s22 = smov 128   ;;  %s792_s23 = smov 8  }
  0x10   :  { %22 = dma.hbm_to_vmem [thread:$0]  %s889_s1, 8320, %s17_s13, [#allocation3], %s791_s22, %s791_s22, %s792_s23  }
  0x11   :  { %788 = dma.done.wait [#allocation3], 8320  }
  0x12   :  { %789 = vsyncadd [#allocation3], 4294958976  ;;  %v793_v0 = vmov 0   ;;  %v29_v1 = vld [vmem:[#allocation2] sm:$0xff]  ;;  %vm126_vm0 = vcmask 1043456   ;;  %vm122_vm1 = vcmask 64512   ;;  %v107_v7 = vlaneseq }
  0x13   :  { %165 = vmatprep.mubr.bf16.mxu0 %v793_v0  ;;  %v104_v2 = vld [vmem:[%s888_s0] sm:$0xff]  ;;  %v597_v3 = vcombine.high %v29_v1, %v29_v1  ;;  %v596_v4 = vcombine.low %v29_v1, %v29_v1  ;;  %v720_v28 = vld [vmem:[#allocation2 + $0x88] ss:$8 sps:$4 sm:$0xff]   ;;  %vm795_vm2 = vmmov 0  }
  0x14   :  { %v105_v6 = vpack.c.bf16 %v104_v2, %v104_v2  ;;  %v108_v8 = vshrl.u32 %v107_v7, 7  ;;  %v94_v10 = vld [vmem:[%s890_s2] ss:$8 sm:$0x3]  ;;  %632 = vmatprep.subr.bf16.mxu1 %v720_v28 }
  0x15   :  { %598 = vmatprep.subr.msk.bf16.mxu0 %vm126_vm0, %v597_v3  ;;  %v128_v5 = vsel %vm126_vm0, %v596_v4, 0  ;;  %v721_v29 = vld [vmem:[#allocation2 + $0x8] ss:$8 sps:$4 sm:$0xff]   ;;  %v722_v30 = vld [vmem:[#allocation2 + $0x98] ss:$8 sps:$4 sm:$0xff]  }
  0x16   :  { %134 = vmatpush1.bf16.msra.mxu0 %v128_v5  ;;  %v832_v9 = vsub.s32 0, %v108_v8  ;;  %v837_v11 = vsub.s32 1, %v108_v8  ;;  %633 = vmatpush3.bf16.msra.mxu1 %v721_v29  ;;  %v723_v31 = vld [vmem:[#allocation2 + $0x18] ss:$8 sps:$4 sm:$0xff]   ;;  %v724_v32 = vld [vmem:[#allocation2 + $0xa8] ss:$8 sps:$4 sm:$0xff]  }
  0x17   :  { %634 = vmatprep.subr.bf16.mxu1 %v722_v30  ;;  %v725_v33 = vld [vmem:[#allocation2 + $0x28] ss:$8 sps:$4 sm:$0xff]   ;;  %v726_v34 = vld [vmem:[#allocation2 + $0xb8] ss:$8 sps:$4 sm:$0xff]   ;;  %v794_v29 = vmov 0.0  }
  0x18   :  { %v110_v12 = vrot.slane %v94_v10, %v832_v9  ;;  %v114_v13 = vrot.slane %v94_v10, %v837_v11  ;;  %v727_v35 = vld [vmem:[#allocation2 + $0x38] ss:$8 sps:$4 sm:$0xff]   ;;  %v728_v36 = vld [vmem:[#allocation2 + $0xc8] ss:$8 sps:$4 sm:$0xff]   ;;  %672 = vmatprep.subr.bf16.mxu0 %v794_v29 }
  0x19   :  { %599 = vmatmul.mubr.msk.bf16.vlgmr.msra.gmra.mrb[0].mxu0 %vm122_vm1, %v105_v6  ;;  %v729_v37 = vld [vmem:[#allocation2 + $0x48] ss:$8 sps:$4 sm:$0xff]   ;;  %v730_v38 = vld [vmem:[#allocation2 + $0xd8] ss:$8 sps:$4 sm:$0xff]  }
  0x1a   :  { %635 = vmatpush3.bf16.msra.mxu1 %v723_v31  ;;  %v731_v39 = vld [vmem:[#allocation2 + $0x58] ss:$8 sps:$4 sm:$0xff]   ;;  %v732_v40 = vld [vmem:[#allocation2 + $0xe8] ss:$8 sps:$4 sm:$0xff]   ;;  %688 = vmatprep.mubr.msk.bf16.mxu0 %vm795_vm2, %v794_v29 }
  0x1b   :  { %636 = vmatprep.subr.bf16.mxu1 %v724_v32  ;;  %v733_v41 = vld [vmem:[#allocation2 + $0x68] ss:$8 sps:$4 sm:$0xff]   ;;  %v734_v42 = vld [vmem:[#allocation2 + $0xf8] ss:$8 sps:$4 sm:$0xff]  }
  0x1c   :  { %v735_v43 = vld [vmem:[#allocation2 + $0x78] ss:$8 sps:$4 sm:$0xff]   ;;  %v736_v28 = vld [vmem:[#allocation2 + $0x108] ss:$8 sps:$4 sm:$0xff]  }
  0x1d   :  { %v594_v47 = vld [vmem:[%s890_s2 + $0x1] ss:$8 sm:$0x3]  ;;  %v595_v48 = vld [vmem:[%s890_s2 + $0x2] ss:$8 sm:$0x3]  ;;  %673 = vmatpush3.bf16.msra.mxu0 %v736_v28 }
  0x1e   :  { %637 = vmatpush3.bf16.msra.mxu1 %v725_v33  ;;  %v195_v49 = vrot.slane %v594_v47, %v832_v9  ;;  %v199_v50 = vrot.slane %v594_v47, %v837_v11  ;;  %v208_v52 = vrot.slane %v595_v48, %v832_v9  ;;  %v212_v55 = vrot.slane %v595_v48, %v837_v11  ;;  %v737_v30 = vld [vmem:[#allocation2 + $0x118] ss:$8 sps:$4 sm:$0xff]   ;;  %v738_v31 = vld [vmem:[#allocation2 + $0x128] ss:$8 sps:$4 sm:$0xff]  }
  0x1f   :  { %638 = vmatprep.subr.bf16.mxu1 %v726_v34  ;;  %674 = vmatprep.subr.bf16.mxu0 %v794_v29  ;;  %v739_v32 = vld [vmem:[#allocation2 + $0x138] ss:$8 sps:$4 sm:$0xff]   ;;  %v740_v33 = vld [vmem:[#allocation2 + $0x148] ss:$8 sps:$4 sm:$0xff]  }
  0x20   :  { %v741_v34 = vld [vmem:[#allocation2 + $0x158] ss:$8 sps:$4 sm:$0xff]  }
  0x21   :  { %675 = vmatpush3.bf16.msra.mxu0 %v737_v30 }
  0x22   :  { %639 = vmatpush3.bf16.msra.mxu1 %v727_v35  ;;  %676 = vmatprep.subr.bf16.mxu0 %v794_v29  ;;  %v742_v35 = vld [vmem:[#allocation2 + $0x168] ss:$8 sps:$4 sm:$0xff]  }
  0x23   :  { %640 = vmatprep.subr.bf16.mxu1 %v728_v36  ;;  %v743_v36 = vld [vmem:[#allocation2 + $0x178] ss:$8 sps:$4 sm:$0xff]  }
  0x25   :  { %677 = vmatpush3.bf16.msra.mxu0 %v738_v31 }
  0x26   :  { %641 = vmatpush3.bf16.msra.mxu1 %v729_v37  ;;  %678 = vmatprep.subr.bf16.mxu0 %v794_v29 }
  0x27   :  { %642 = vmatprep.subr.bf16.mxu1 %v730_v38 }
  0x29   :  { %679 = vmatpush3.bf16.msra.mxu0 %v739_v32 }
  0x2a   :  { %643 = vmatpush3.bf16.msra.mxu1 %v731_v39  ;;  %680 = vmatprep.subr.bf16.mxu0 %v794_v29 }
  0x2b   :  { %644 = vmatprep.subr.bf16.mxu1 %v732_v40 }
  0x2d   :  { %681 = vmatpush3.bf16.msra.mxu0 %v740_v33 }
  0x2e   :  { %645 = vmatpush3.bf16.msra.mxu1 %v733_v41  ;;  %682 = vmatprep.subr.bf16.mxu0 %v794_v29  ;;  %v100_v41 = vld [vmem:[%s890_s2 + $0x4] ss:$0 sm:$0xff] }
  0x2f   :  { %646 = vmatprep.subr.bf16.mxu1 %v734_v42 }
  0x31   :  { %683 = vmatpush3.bf16.msra.mxu0 %v741_v34 }
  0x32   :  { %647 = vmatpush3.bf16.msra.mxu1 %v735_v43  ;;  %684 = vmatprep.subr.bf16.mxu0 %v794_v29  ;;  %v101_v43 = vld [vmem:[%s890_s2 + $0x5] ss:$0 sm:$0xff] }
  0x33   :  { %692 = vmatprep.subr.bf16.mxu1 %v794_v29 }
  0x35   :  { %685 = vmatpush3.bf16.msra.mxu0 %v742_v35 }
  0x36   :  { %686 = vmatprep.subr.bf16.mxu0 %v794_v29 }
  0x39   :  { %687 = vmatpush3.bf16.msra.mxu0 %v743_v36 }
  0xec   :  { %v167_v14 = vpop.f32.mrb[0].mxu0 }
  0xed   :  { %v168_v15 = vadd.f32 %v167_v14, %v110_v12  ;;  %v169_v16 = vpop.f32.mrb[1].mxu0 }
  0xee   :  { %v170_v17 = vadd.f32 %v169_v16, %v114_v13  ;;  %v171_v18 = vpop.f32.mrb[2].mxu0 }
  0xef   :  { %v172_v19 = vpop.f32.mrb[3].mxu0 }
  0xf0   :  { %v174_v20 = vadd.f32 %v170_v17, %v168_v15  ;;  %v99_v19 = vld [vmem:[%s890_s2 + $0x3] ss:$0 sm:$0xff] }
  0xf2   :  { %175 = vadd.xlane.f32.xlu0 %v174_v20 }
 0x17f   :  { %v176_v21 = vpop.xlane.xlu0 %175 }
 0x180   :  { %v178_v22 = vmul.f32 0.00390625, %v176_v21 }
 0x182   :  { %v179_v23 = vsub.f32 %v168_v15, %v178_v22  ;;  %v180_v24 = vsub.f32 %v170_v17, %v178_v22 }
 0x184   :  { %v181_v25 = vmul.f32 %v179_v23, %v179_v23  ;;  %v182_v26 = vmul.f32 %v180_v24, %v180_v24 }
 0x186   :  { %v183_v27 = vadd.f32 %v182_v26, %v181_v25 }
 0x188   :  { %184 = vadd.xlane.f32.xlu0 %v183_v27 }
 0x215   :  { %v185_v44 = vpop.xlane.xlu0 %184 }
 0x216   :  { %v186_v45 = vmul.f32 0.00390625, %v185_v44 }
 0x218   :  { %v187_v46 = vadd.f32 1e-05, %v186_v45 }
 0x21a   :  { %752 = vrsqrt.f32 %v187_v46 }
 0x224   :  { %v753_v51 = vpop.eup %752 }
 0x225   :  { %v189_v53 = vmul.f32 %v753_v51, %v179_v23  ;;  %v190_v54 = vmul.f32 %v753_v51, %v180_v24 }
 0x227   :  { %v202_v56 = vmul.f32 %v195_v49, %v189_v53  ;;  %v203_v57 = vmul.f32 %v199_v50, %v190_v54 }
 0x229   :  { %v216_v58 = vadd.f32 %v212_v55, %v203_v57  ;;  %v215_v59 = vadd.f32 %v208_v52, %v202_v56  ;;  %v744_v56 = vld [vmem:[#allocation2 + $0x188] ss:$8 sps:$4 sm:$0xff]   ;;  %v745_v57 = vld [vmem:[#allocation2 + $0x198] ss:$8 sps:$4 sm:$0xff]  }
 0x22b   :  { %v218_v60 = vmul.f32 %v216_v58, %v216_v58  ;;  %v217_v61 = vmul.f32 %v215_v59, %v215_v59 }
 0x22d   :  { %v220_v62 = vmul.f32 %v218_v60, %v216_v58  ;;  %v219_v63 = vmul.f32 %v217_v61, %v215_v59  ;;  %v748_v60 = vld [vmem:[#allocation2 + $0x1c8] ss:$8 sps:$4 sm:$0xff]   ;;  %v749_v61 = vld [vmem:[#allocation2 + $0x1d8] ss:$8 sps:$4 sm:$0xff]  }
 0x22f   :  { %v222_v0 = vmul.f32 0.044715, %v220_v62  ;;  %v221_v1 = vmul.f32 0.044715, %v219_v63  ;;  %v750_v62 = vld [vmem:[#allocation2 + $0x1e8] ss:$8 sps:$4 sm:$0xff]  }
 0x230   :  { %v751_v63 = vld [vmem:[#allocation2 + $0x1f8] ss:$8 sps:$4 sm:$0xff]  }
 0x231   :  { %v224_v2 = vadd.f32 %v222_v0, %v216_v58  ;;  %v223_v3 = vadd.f32 %v221_v1, %v215_v59  ;;  %v102_v0 = vld [vmem:[%s890_s2 + $0x6] ss:$0 sm:$0xff] }
 0x233   :  { %v226_v4 = vmul.f32 0.7978846, %v224_v2  ;;  %v225_v5 = vmul.f32 0.7978846, %v223_v3 }
 0x235   :  { %754 = vtanh.f32 %v226_v4 }
 0x236   :  { %756 = vtanh.f32 %v225_v5 }
 0x23f   :  { %v755_v6 = vpop.eup %754 }
 0x240   :  { %v757_v8 = vpop.eup %756  ;;  %v230_v9 = vadd.f32 1.0, %v755_v6 }
 0x241   :  { %v229_v10 = vadd.f32 1.0, %v757_v8 }
 0x242   :  { %v232_v11 = vmul.f32 0.5, %v230_v9 }
 0x243   :  { %v231_v12 = vmul.f32 0.5, %v229_v10 }
 0x244   :  { %v234_v13 = vmul.f32 %v232_v11, %v216_v58  ;;  %v746_v58 = vld [vmem:[#allocation2 + $0x1a8] ss:$8 sps:$4 sm:$0xff]  }
 0x245   :  { %v233_v14 = vmul.f32 %v231_v12, %v215_v59  ;;  %v747_v59 = vld [vmem:[#allocation2 + $0x1b8] ss:$8 sps:$4 sm:$0xff]  }
 0x246   :  { %v236_v15 = vpack.c.bf16 %v234_v13, %v234_v13 }
 0x247   :  { %v235_v16 = vpack.c.bf16 %v233_v14, %v233_v14 }
 0x248   :  { %365 = vmatprep.mubr.bf16.mxu1 %v236_v15 }
 0x249   :  { %366 = vmatmul.mubr.bf16.vlgmr.msra.gmra.mrb[0].mxu1 %v235_v16 }
 0x24a   :  { %708 = vmatprep.mubr.msk.bf16.mxu1 %vm795_vm2, %v794_v29  ;;  %693 = vmatpush3.bf16.msra.mxu1 %v744_v56 }
 0x24b   :  { %694 = vmatprep.subr.bf16.mxu1 %v794_v29 }
 0x24e   :  { %695 = vmatpush3.bf16.msra.mxu1 %v745_v57 }
 0x24f   :  { %696 = vmatprep.subr.bf16.mxu1 %v794_v29 }
 0x252   :  { %697 = vmatpush3.bf16.msra.mxu1 %v746_v58 }
 0x253   :  { %698 = vmatprep.subr.bf16.mxu1 %v794_v29 }
 0x256   :  { %699 = vmatpush3.bf16.msra.mxu1 %v747_v59 }
 0x257   :  { %700 = vmatprep.subr.bf16.mxu1 %v794_v29 }
 0x25a   :  { %701 = vmatpush3.bf16.msra.mxu1 %v748_v60 }
 0x25b   :  { %702 = vmatprep.subr.bf16.mxu1 %v794_v29 }
 0x25e   :  { %703 = vmatpush3.bf16.msra.mxu1 %v749_v61 }
 0x25f   :  { %704 = vmatprep.subr.bf16.mxu1 %v794_v29 }
 0x262   :  { %705 = vmatpush3.bf16.msra.mxu1 %v750_v62 }
 0x263   :  { %706 = vmatprep.subr.bf16.mxu1 %v794_v29 }
 0x266   :  { %707 = vmatpush3.bf16.msra.mxu1 %v751_v63 }
 0x31c   :  { %v648_v17 = vpop.f32.mrb[0].mxu1 }
 0x31d   :  { %v649_v18 = vpop.f32.mrb[1].mxu1 }
 0x31e   :  { %v650_v20 = vadd.f32 %v649_v18, %v648_v17  ;;  %v651_v21 = vpop.f32.mrb[2].mxu1  ;;  %v103_v17 = vld [vmem:[%s890_s2 + $0x7] ss:$0 sm:$0xff] }
 0x31f   :  { %v652_v22 = vpop.f32.mrb[3].mxu1 }
 0x320   :  { %v368_v23 = vadd.f32 %v650_v20, %v99_v19 }
 0x322   :  { %373 = vadd.xlane.f32.xlu1 %v368_v23 }
 0x3af   :  { %v374_v24 = vpop.xlane.xlu1 %373 }
 0x3b0   :  { %v376_v25 = vmul.f32 0.0078125, %v374_v24 }
 0x3b2   :  { %v377_v26 = vsub.f32 %v368_v23, %v376_v25  ;;  %v584_v23 = vand.u32 127, %v107_v7 }
 0x3b4   :  { %v378_v27 = vmul.f32 %v377_v26, %v377_v26  ;;  %vm585_vm3 = vcmp.lt.s32.totalorder %v584_v23, 4 }
 0x3b6   :  { %379 = vadd.xlane.f32.xlu1 %v378_v27 }
 0x443   :  { %v380_v37 = vpop.xlane.xlu1 %379 }
 0x444   :  { %v381_v38 = vmul.f32 0.0078125, %v380_v37 }
 0x446   :  { %v382_v39 = vadd.f32 1e-05, %v381_v38 }
 0x448   :  { %758 = vrsqrt.f32 %v382_v39 }
 0x452   :  { %v759_v40 = vpop.eup %758 }
 0x453   :  { %v384_v42 = vmul.f32 %v759_v40, %v377_v26 }
 0x455   :  { %v385_v44 = vmul.f32 %v384_v42, %v100_v41 }
 0x457   :  { %v386_v45 = vadd.f32 %v385_v44, %v101_v43 }
 0x459   :  { %v387_v46 = vmul.f32 %v386_v45, %v386_v45 }
 0x45b   :  { %v388_v47 = vmul.f32 %v387_v46, %v386_v45 }
 0x45d   :  { %v389_v48 = vmul.f32 0.044715, %v388_v47 }
 0x45f   :  { %v390_v49 = vadd.f32 %v389_v48, %v386_v45 }
 0x461   :  { %v391_v50 = vmul.f32 0.7978846, %v390_v49 }
 0x463   :  { %760 = vtanh.f32 %v391_v50 }
 0x46d   :  { %v761_v51 = vpop.eup %760 }
 0x46e   :  { %v393_v52 = vadd.f32 1.0, %v761_v51 }
 0x470   :  { %v394_v53 = vmul.f32 0.5, %v393_v52 }
 0x472   :  { %v395_v54 = vmul.f32 %v394_v53, %v386_v45 }
 0x474   :  { %v396_v55 = vpack.c.bf16 %v395_v54, %v395_v54 }
 0x476   :  { %689 = vmatmul.mubr.bf16.vlgmr.msra.gmra.mrb[4].mxu0 %v396_v55 }
 0x549   :  { %v479_v1 = vpop.f32.mrb[4].mxu0 }
 0x54a   :  { %v480_v2 = vadd.f32 %v479_v1, %v102_v0  ;;  %v690_v3 = vpop.f32.mrb[5].mxu0 }
 0x54b   :  { %v482_v4 = vpop.f32.mrb[6].mxu0 }
 0x54c   :  { %v485_v5 = vmul.f32 %v480_v2, %v480_v2  ;;  %v691_v6 = vpop.f32.mrb[7].mxu0 }
 0x54e   :  { %v486_v8 = vmul.f32 %v485_v5, %v480_v2 }
 0x550   :  { %v487_v9 = vmul.f32 0.044715, %v486_v8 }
 0x552   :  { %v488_v10 = vadd.f32 %v487_v9, %v480_v2 }
 0x554   :  { %v489_v11 = vmul.f32 0.7978846, %v488_v10 }
 0x556   :  { %762 = vtanh.f32 %v489_v11 }
 0x560   :  { %v763_v12 = vpop.eup %762 }
 0x561   :  { %v491_v13 = vadd.f32 1.0, %v763_v12 }
 0x563   :  { %v492_v14 = vmul.f32 0.5, %v491_v13 }
 0x565   :  { %v493_v15 = vmul.f32 %v492_v14, %v480_v2 }
 0x567   :  { %v494_v16 = vpack.c.bf16 %v493_v15, %v493_v15 }
 0x569   :  { %709 = vmatmul.mubr.bf16.vlgmr.msra.gmra.mrb[4].mxu1 %v494_v16 }
 0x63c   :  { %v577_v18 = vpop.f32.mrb[4].mxu1 }
 0x63d   :  { %v578_v19 = vadd.f32 %v577_v18, %v103_v17  ;;  %v710_v20 = vpop.f32.mrb[5].mxu1 }
 0x63e   :  { %v580_v21 = vpop.f32.mrb[6].mxu1 }
 0x63f   :  { %764 = vtanh.f32 %v578_v19  ;;  %v711_v22 = vpop.f32.mrb[7].mxu1 }
 0x649   :  { %v765_v24 = vpop.eup %764 }
 0x64a   :  { %v587_v25 = vsel %vm585_vm3, %v765_v24, %v578_v19 }
 0x64b   :  { %588 = vst [vmem:[%s891_s3] sm:$0xff] %v587_v25 }
 0x64c   :  { %593 = vsyncpa [#allocation3], 1 }

</bundles_post_ra>
